<compile_context>
chip_gen: v6e
topology: v6e:2x2x1
jax: 0.10.0
libtpu: 0.0.40
codegen_flags: <defaults>
</compile_context>

<pallas_src>
import functools

import jax
import jax.numpy as jnp
from jax.experimental import pallas as pl
from jax.experimental.pallas import tpu as pltpu


def _round_up(x, m):
    return ((x + m - 1) // m) * m


def _item_emb_kernel(x_ref, tab_ref, out_ref, *, num_rate):
    # x_ref: (TB, K) int8 — lanes [0,num_rate) = one_hot(rate), [num_rate,K) = genre bits
    xi = x_ref[...].astype(jnp.float32)                        # int8 -> f32 (VPU)
    tb, k = xi.shape

    lane = jax.lax.broadcasted_iota(jnp.int32, (tb, k), 1)     # (TB, K)
    is_genre = lane >= num_rate

    # row sum over the genre lanes only (rate one-hot lanes excluded)
    gsum = jnp.sum(jnp.where(is_genre, xi, 0.0), axis=1, keepdims=True)  # (TB, 1)
    inv_g = pl.reciprocal(gsum)            # 1 recip/row instead of G divides/row

    # M = [ one_hot(rate) | genre / row_sum(genre) ]  via a single select
    # (no in-kernel lane slice or lane concat).
    m = xi * jnp.where(is_genre, inv_g, 1.0)                   # (TB, K)

    # single fused MXU matmul against the block-diagonal combined table:
    # (TB, K) @ (K, 2*D) -> already-concatenated output tile, one store.
    out_ref[...] = jnp.dot(m, tab_ref[...],
                           preferred_element_type=jnp.float32
                           ).astype(out_ref.dtype)


def item_ml_forward(x, rate_tab, genre_w, *, block_b=8192):
    """x: (B, 1+num_genre) int; rate_tab: (num_rate, D); genre_w: (D, num_genre)
    (nn.Linear weight layout, out_features x in_features). Returns (B, 2*D) f32."""
    B, C = x.shape
    num_rate, D = rate_tab.shape
    num_genre = C - 1
    assert genre_w.shape == (D, num_genre)

    out_w = 2 * D                       # exact width: no lane padding, no slice pass
    K = num_rate + num_genre

    # Block-diagonal combined table [[E_rate, 0], [0, W_g.T]]  -> (K, 2*D)
    tab = jnp.zeros((K, out_w), jnp.float32)
    tab = tab.at[:num_rate, :D].set(rate_tab.astype(jnp.float32))
    tab = tab.at[num_rate:, D:].set(genre_w.T.astype(jnp.float32))

    # Batch tiling: int8 input needs sublane multiples of 32; cap TB at ~half the
    # padded batch so the parallel grid has >=2 steps (v7x has 2 TensorCores).
    b32 = _round_up(B, 32)
    half = _round_up((b32 + 1) // 2, 32)
    TB = max(32, min(block_b, half))
    B_pad = _round_up(B, TB)

    # Repack indices as int8 (rate < 256, genre bits are 0/1):
    #   lanes [0, num_rate) = one_hot(rate_idx); lanes [num_rate, K) = genre bits.
    rate_oh = (x[:, 0:1] == jnp.arange(num_rate, dtype=x.dtype)[None, :])
    xi8 = jnp.concatenate([rate_oh.astype(jnp.int8),
                           x[:, 1:].astype(jnp.int8)], axis=1)          # (B, K)
    if B_pad != B:
        # padded rows: valid rate one-hot + one genre bit -> no 0/0; sliced off below
        pad = jnp.zeros((B_pad - B, K), jnp.int8)
        pad = pad.at[:, 0].set(1).at[:, num_rate].set(1)
        xi8 = jnp.concatenate([xi8, pad], axis=0)

    grid = (B_pad // TB,)
    kernel = functools.partial(_item_emb_kernel, num_rate=num_rate)

    flops = 2 * B_pad * K * out_w
    bytes_acc = B_pad * K + 4 * (K * out_w + B_pad * out_w)   # int8 in, f32 tab/out

    out = pl.pallas_call(
        kernel,
        out_shape=jax.ShapeDtypeStruct((B_pad, out_w), jnp.float32),
        grid_spec=pltpu.PrefetchScalarGridSpec(
            num_scalar_prefetch=0,
            grid=grid,
            in_specs=[
                pl.BlockSpec((TB, K), lambda i: (i, 0)),        # int8 indices, streamed
                pl.BlockSpec((K, out_w), lambda i: (0, 0)),     # table, VMEM-resident
            ],
            out_specs=pl.BlockSpec((TB, out_w), lambda i: (i, 0)),
        ),
        compiler_params=pltpu.CompilerParams(
            dimension_semantics=("parallel",)),
        cost_estimate=pl.CostEstimate(flops=flops, transcendentals=0,
                                      bytes_accessed=bytes_acc),
    )(xi8, tab)

    return out if B_pad == B else out[:B]


def make_params(key, config):
    """Deterministic parameter init (nn.Embedding / nn.Linear shapes; N(0,1))."""
    D = config['embedding_dim']
    kr, kg = jax.random.split(key)
    rate_tab = jax.random.normal(kr, (config['num_rate'], D), jnp.float32)
    genre_w = jax.random.normal(kg, (D, config['num_genre']), jnp.float32)
    return rate_tab, genre_w


if __name__ == "__main__":
    config = {'num_rate': 6, 'num_genre': 25, 'embedding_dim': 32}
    B = 8
    D = config['embedding_dim']

    key = jax.random.PRNGKey(0)
    kparams, kx1, kx2 = jax.random.split(key, 3)
    rate_tab, genre_w = make_params(kparams, config)

    # Deterministic inputs: rate index in [0, num_rate), multi-hot genre bits
    # with at least one genre per row (well-formed MovieLens rows).
    rate_idx = jax.random.randint(kx1, (B, 1), 0, config['num_rate'],
                                  dtype=jnp.int32)
    genre_bits = jax.random.bernoulli(
        kx2, 0.3, (B, config['num_genre'])).astype(jnp.int32)
    genre_bits = genre_bits.at[:, 0].set(
        jnp.maximum(genre_bits[:, 0],
                    (genre_bits.sum(axis=1) == 0).astype(jnp.int32)))
    x = jnp.concatenate([rate_idx, genre_bits], axis=1)   # (B, 26) int32

    out = jax.block_until_ready(item_ml_forward(x, rate_tab, genre_w))

    # Pure-JAX reference (same math as the PyTorch module).
    gf = genre_bits.astype(jnp.float32)
    ref = jnp.concatenate(
        [rate_tab[x[:, 0]],
         (gf @ genre_w.T) / jnp.sum(gf, axis=1, keepdims=True)],
        axis=1)

    assert out.shape == (B, 2 * D)
    assert out.dtype == jnp.float32
    assert jnp.allclose(out, ref, atol=1e-5, rtol=1e-4), "mismatch vs reference"

    print("KERNEL_OK")
</pallas_src>

<mosaic_0001>
module attributes {stable_mosaic.version = 11 : i64} {
  func.func @_item_emb_kernel(%arg0: i32, %arg1: memref<32x31xi8, #tpu.memory_space<vmem>>, %arg2: memref<31x64xf32, #tpu.memory_space<vmem>>, %arg3: memref<32x64xf32, #tpu.memory_space<vmem>>) attributes {dimension_semantics = [#tpu.dimension_semantics<parallel>], iteration_bounds = array<i64: 1>, scalar_prefetch = 0 : i64, scratch_operands = 0 : i64, tpu.core_type = #tpu.core_type<tc>, window_params = [{transform_indices = @transform_0, window_bounds = array<i64: 32, 31>}, {pipeline_mode = #tpu.pipeline_mode<synchronous>, transform_indices = @transform_1, window_bounds = array<i64: 31, 64>}, {transform_indices = @transform_2, window_bounds = array<i64: 32, 64>}]} {
    %c0 = arith.constant 0 : index
    %c0_0 = arith.constant 0 : index
    %0 = vector.load %arg1[%c0, %c0_0] : memref<32x31xi8, #tpu.memory_space<vmem>>, vector<32x31xi8>
    %1 = arith.sitofp %0 : vector<32x31xi8> to vector<32x31xf32>
    %2 = tpu.iota {dimensions = array<i32: 1>} : vector<32x31xi32>
    %c6_i32 = arith.constant 6 : i32
    %3 = vector.broadcast %c6_i32 : i32 to vector<32x31xi32>
    %4 = arith.cmpi sge, %2, %3 : vector<32x31xi32>
    %cst = arith.constant 0.000000e+00 : f32
    %5 = vector.broadcast %cst : f32 to vector<32x31xf32>
    %6 = arith.select %4, %1, %5 : vector<32x31xi1>, vector<32x31xf32>
    %cst_1 = arith.constant dense<0.000000e+00> : vector<32xf32>
    %7 = vector.multi_reduction <add>, %6, %cst_1 [1] : vector<32x31xf32> to vector<32xf32>
    %8 = vector.shape_cast %7 : vector<32xf32> to vector<32x1xf32>
    %9 = tpu.reciprocal %8 : vector<32x1xf32> -> vector<32x1xf32>
    %cst_2 = arith.constant 1.000000e+00 : f32
    %10 = vector.shape_cast %9 : vector<32x1xf32> to vector<32x1xf32>
    %11 = vector.broadcast %10 : vector<32x1xf32> to vector<32x31xf32>
    %12 = vector.broadcast %cst_2 : f32 to vector<32x31xf32>
    %13 = arith.select %4, %11, %12 : vector<32x31xi1>, vector<32x31xf32>
    %14 = arith.mulf %1, %13 : vector<32x31xf32>
    %c0_3 = arith.constant 0 : index
    %c0_4 = arith.constant 0 : index
    %15 = vector.load %arg2[%c0_3, %c0_4] : memref<31x64xf32, #tpu.memory_space<vmem>>, vector<31x64xf32>
    %cst_5 = arith.constant dense<0.000000e+00> : vector<32x64xf32>
    %16 = tpu.matmul %14, %15, %cst_5 {dimension_numbers = #tpu.dot_dimension_numbers<[1], [0], [0], [1], [0, 0, 1, 1], [], []>} : vector<32x31xf32>, vector<31x64xf32>, vector<32x64xf32> -> vector<32x64xf32>
    %c0_6 = arith.constant 0 : index
    %c0_7 = arith.constant 0 : index
    %17 = vector.load %arg3[%c0_6, %c0_7] : memref<32x64xf32, #tpu.memory_space<vmem>>, vector<32x64xf32>
    tpu.vector_store %arg3[%c0_6, %c0_7], %16 {strides = array<i32>} : memref<32x64xf32, #tpu.memory_space<vmem>>, vector<32x64xf32>,
    return
  }
  func.func @transform_0(%arg0: i32) -> (i32, i32) {
    %c0_i32 = arith.constant 0 : i32
    %c0_i32_0 = arith.constant 0 : i32
    return %arg0, %c0_i32 : i32, i32
  }
  func.func @transform_1(%arg0: i32) -> (i32, i32) {
    %c0_i32 = arith.constant 0 : i32
    %c0_i32_0 = arith.constant 0 : i32
    %c0_i32_1 = arith.constant 0 : i32
    return %c0_i32, %c0_i32_0 : i32, i32
  }
  func.func @transform_2(%arg0: i32) -> (i32, i32) {
    %c0_i32 = arith.constant 0 : i32
    %c0_i32_0 = arith.constant 0 : i32
    return %arg0, %c0_i32 : i32, i32
  }
}

</mosaic_0001>

<bundles_post_ra>
// kernel: tpu_custom_call.1
= control target key start
LH: loop header
LB: loop body
LE: loop exit
PB: predicated region body
PF: predicated region fallthrough
CT: control target
= control target key end

     0   :  { %7 = vsyncpa [#allocation3], 0  ;;  %s383_s0 = inlined_call_operand.hbm [shape: s8[32,31], index: 0, kind: input, shape index: {}]   ;;  %s384_s1 = inlined_call_operand.hbm [shape: f32[31,64], index: 1, kind: input, shape index: {}]   ;;  %s385_s2 = inlined_call_operand.hbm [shape: f32[32,64], index: 2, kind: output, shape index: {}]  }
   0x1   :  { %8 = vsyncpa [#allocation6], 0 }
   0x2   :  { %9 = vsyncpa [#allocation4], 0  ;;  %s321_s9 = smov [#allocation2]   ;;  %s322_s11 = smov [#allocation5]  }
   0x3   :  { %s16_s10 = sshll.u32 %s321_s9, 4  ;;  %s25_s12 = sshll.u32 %s322_s11, 4  ;;  %s17_s10 = int_to_ptr.vmem [resolvable:$true] %s16_s10  ;;  %s26_s12 = int_to_ptr.vmem [resolvable:$true] %s25_s12 }
   0x4   :  { %s263_s13 = scalar_lea.vmem %s17_s10, 128  ;;  %p268_p1 = scmp.lt.s32.totalorder %s17_s10, %s17_s10 }
   0x5   :  { %p264_p0 = scmp.ne.s32.totalorder %s17_s10, %s263_s13  ;;  %p269_p2 = scmp.lt.s32.totalorder %s263_s13, %s263_s13 }
   0x7   :  { %p270_p3 = por %p269_p2, %p268_p1 }
   0x9   :  { %p271_p4 = pnand %p270_p3, %p264_p0 }
   0xb   :  { %274 = shalt.err (!%p271_p4)
}
   0xc   :  { %19 = dma.hbm_to_vmem [thread:$0]  %s383_s0, 128, %s17_s10, [#allocation3]  }
   0xd   :  { %s283_s16 = scalar_lea.vmem %s26_s12, 512  ;;  %p288_p6 = scmp.lt.s32.totalorder %s26_s12, %s26_s12 }
   0xe   :  { %p284_p5 = scmp.ne.s32.totalorder %s26_s12, %s283_s16  ;;  %p289_p7 = scmp.lt.s32.totalorder %s283_s16, %s283_s16 }
  0x10   :  { %p290_p8 = por %p289_p7, %p288_p6 }
  0x12   :  { %p291_p9 = pnand %p290_p8, %p284_p5 }
  0x14   :  { %294 = shalt.err (!%p291_p9)
}
  0x15   :  { %s323_s17 = smov 128   ;;  %s324_s18 = smov 8  }
  0x16   :  { %31 = dma.hbm_to_vmem [thread:$0]  %s384_s1, 512, %s26_s12, [#allocation6], %s323_s17, %s323_s17, %s324_s18  }
  0x17   :  { %315 = dma.done.wait [#allocation3], 128  }
  0x18   :  { %316 = vsyncadd [#allocation3], 4294967168 }
  0x19   :  { %317 = dma.done.wait [#allocation6], 512  }
  0x1a   :  { %318 = vsyncadd [#allocation6], 4294966784  ;;  %v47_v0 = vlaneseq  ;;  %v38_v2 = vld [vmem:[#allocation2] sm:$0xff]  ;;  %vm54_vm1 = vcmask 252928   ;;  %vm95_vm2 = vcmask 1046528   ;;  %v81_v20 = vld [vmem:[#allocation5 + $0x10] sm:$0xff] }
  0x1b   :  { %v39_v3 = vunpack.c.0.s8 %v38_v2  ;;  %v40_v4 = vunpack.c.1.s8 %v38_v2  ;;  %v41_v5 = vunpack.c.2.s8 %v38_v2  ;;  %v42_v6 = vunpack.c.3.s8 %v38_v2  ;;  %v82_v19 = vld [vmem:[#allocation5 + $0x18] sm:$0x7f]  ;;  %v80_v21 = vld [vmem:[#allocation5 + $0x8] sm:$0xff]  ;;  %v79_v22 = vld [vmem:[#allocation5] sm:$0xff]  ;;  %s325_s0 = smov [#allocation7]  }
  0x1c   :  { %v350_v1 = vand.u32 127, %v47_v0  ;;  %220 = vmatprep.subr.msk.mxu0 %vm95_vm2, %v82_v19  ;;  %234 = vmatprep.subr.msk.mxu1 %vm95_vm2, %v82_v19  ;;  %vm184_vm3 = vcmask 523264   ;;  %s194_s1 = sshll.u32 %s325_s0, 4  ;;  %s195_s1 = int_to_ptr.vmem [resolvable:$true] %s194_s1 }
  0x1d   :  { %v43_v7 = vcvt.s32.f32 %v39_v3  ;;  %v44_v8 = vcvt.s32.f32 %v40_v4  ;;  %v45_v9 = vcvt.s32.f32 %v41_v5  ;;  %v46_v10 = vcvt.s32.f32 %v42_v6  ;;  %221 = vmatpush3.msk.msra.mxu0 %vm95_vm2, %v82_v19  ;;  %238 = vmatpush3.msk.msra.mxu1 %vm95_vm2, %v82_v19  ;;  %s295_s21 = scalar_lea.vmem %s195_s1, 512  ;;  %p300_p11 = scmp.lt.s32.totalorder %s195_s1, %s195_s1 }
  0x1e   :  { %vm49_vm0 = vcmp.ge.s32.totalorder %v350_v1, 6  ;;  %222 = vmatprep.subr.mxu0 %v81_v20  ;;  %235 = vmatprep.subr.mxu1 %v81_v20  ;;  %p296_p10 = scmp.ne.s32.totalorder %s195_s1, %s295_s21  ;;  %p301_p12 = scmp.lt.s32.totalorder %s295_s21, %s295_s21 }
  0x1f   :  { %v50_v11 = vsel %vm49_vm0, %v43_v7, 0.0  ;;  %v51_v12 = vsel %vm49_vm0, %v44_v8, 0.0  ;;  %v52_v13 = vsel %vm49_vm0, %v45_v9, 0.0  ;;  %v53_v14 = vsel %vm49_vm0, %v46_v10, 0.0  ;;  %223 = vmatpush3.msra.mxu0 %v81_v20  ;;  %239 = vmatpush3.msra.mxu1 %v81_v20 }
  0x20   :  { %v55_v15 = vsel %vm54_vm1, %v50_v11, 0.0  ;;  %v58_v16 = vsel %vm54_vm1, %v51_v12, 0.0  ;;  %v61_v17 = vsel %vm54_vm1, %v52_v13, 0.0  ;;  %v64_v18 = vsel %vm54_vm1, %v53_v14, 0.0  ;;  %224 = vmatprep.subr.mxu0 %v80_v21  ;;  %236 = vmatprep.subr.mxu1 %v80_v21  ;;  %p302_p13 = por %p301_p12, %p300_p11 }
  0x21   :  { %56 = vadd.xlane.f32.xlu0 %v55_v15  ;;  %59 = vadd.xlane.f32.xlu1 %v58_v16 }
  0x22   :  { %225 = vmatpush3.msra.mxu0 %v80_v21  ;;  %240 = vmatpush3.msra.mxu1 %v80_v21  ;;  %p303_p0 = pnand %p302_p13, %p296_p10 }
  0x23   :  { %226 = vmatprep.subr.mxu0 %v79_v22  ;;  %237 = vmatprep.subr.mxu1 %v79_v22 }
  0x24   :  { %227 = vmatpush3.msra.mxu0 %v79_v22  ;;  %241 = vmatpush3.msra.mxu1 %v79_v22 }
  0x25   :  { %62 = vadd.xlane.f32.xlu0 %v61_v17  ;;  %65 = vadd.xlane.f32.xlu1 %v64_v18 }
  0xaa   :  { %v57_v23 = vpop.xlane.xlu0 %56  ;;  %v60_v24 = vpop.xlane.xlu1 %59 }
  0xab   :  { %247 = vrcp.f32 %v57_v23 }
  0xac   :  { %249 = vrcp.f32 %v60_v24 }
  0xae   :  { %v63_v25 = vpop.xlane.xlu0 %62  ;;  %v66_v26 = vpop.xlane.xlu1 %65 }
  0xaf   :  { %251 = vrcp.f32 %v63_v25 }
  0xb0   :  { %253 = vrcp.f32 %v66_v26 }
  0xb8   :  { %v248_v27 = vpop.eup %247 }
  0xb9   :  { %v250_v28 = vpop.eup %249  ;;  %v71_v29 = vsel %vm49_vm0, %v248_v27, 1.0 }
  0xba   :  { %v75_v30 = vmul.f32 %v71_v29, %v43_v7  ;;  %v72_v31 = vsel %vm49_vm0, %v250_v28, 1.0 }
  0xbb   :  { %v76_v32 = vmul.f32 %v72_v31, %v44_v8 }
  0xbc   :  { %v252_v33 = vpop.eup %251  ;;  %228 = vmatprep.mubr.msk.f32.mxu0 %vm54_vm1, %v75_v30 }
  0xbd   :  { %v254_v34 = vpop.eup %253  ;;  %229 = vmatmul.mubr.msk.f32.vlgmr.msra.gmra.mxu0 %vm54_vm1, %v76_v32  ;;  %v73_v35 = vsel %vm49_vm0, %v252_v33, 1.0 }
  0xbe   :  { %v77_v36 = vmul.f32 %v73_v35, %v45_v9  ;;  %v74_v37 = vsel %vm49_vm0, %v254_v34, 1.0 }
  0xbf   :  { %v78_v38 = vmul.f32 %v74_v37, %v46_v10 }
  0xc0   :  { %231 = vmatprep.mubr.msk.f32.mxu1 %vm54_vm1, %v77_v36 }
  0xc1   :  { %232 = vmatmul.mubr.msk.f32.vlgmr.msra.gmra.mxu1 %vm54_vm1, %v78_v38 }
 0x17d   :  { %v230_v39 = vpop.f32.mrf.mxu0 }
 0x17e   :  { %186 = vst.msk [vmem:[#allocation7 + $0x8] sm:$0xff] %vm184_vm3, %v230_v39 }
 0x17f   :  { %v165_v40 = vpop.f32.mrf.mxu0 }
 0x180   :  { %185 = vst.msk [vmem:[#allocation7] sm:$0xff] %vm184_vm3, %v165_v40 }
 0x181   :  { %v233_v41 = vpop.f32.mrf.mxu1 }
 0x182   :  { %188 = vst.msk [vmem:[#allocation7 + $0x18] sm:$0xff] %vm184_vm3, %v233_v41 }
 0x183   :  { %v175_v42 = vpop.f32.mrf.mxu1 }
 0x184   :  { %187 = vst.msk [vmem:[#allocation7 + $0x10] sm:$0xff] %vm184_vm3, %v175_v42 }
 0x185   :  { %306 = shalt.err (!%p303_p0)
}
 0x186   :  { %200 = dma.vmem_to_hbm [thread:$0]  %s195_s1, 512, %s385_s2, [#allocation4], %s323_s17, %s323_s17, %s324_s18  }
 0x187   :  { %319 = dma.done.wait [#allocation4], 512  }
 0x188   :  { %320 = vsyncadd [#allocation4], 4294966784 }
 0x189   :  { %204 = vsyncpa [#allocation3], 1 }
 0x18a   :  { %205 = vsyncpa [#allocation6], 1 }
 0x18b   :  { %206 = vsyncpa [#allocation4], 1 }

</bundles_post_ra>
